<compile_context>
chip_gen: v5e
topology: v5e:2x2
jax: 0.10.0
libtpu: 0.0.40
codegen_flags: <defaults>
</compile_context>

<pallas_src>
import functools

import jax
import jax.numpy as jnp
from jax.experimental import pallas as pl
from jax.experimental.pallas import tpu as pltpu


def _round_up(x, m):
    return ((x + m - 1) // m) * m


def _choose_tiles(B, T, D, itemsize, budget_bytes):
    """Pick (tB, tT) for a (B, T, D) input.

    Budgets against the *padded* VMEM footprint of one input block (lanes
    rounded up to 128, sublanes to 8).  Prefers tT == T (no masked tail, one
    contiguous DMA per row, grid_t == 1) and only then grows tB.  When B >= 16
    the batch tile is capped at ~B//2 so the "parallel" B axis keeps >= 2
    blocks (v7x megacore sharding); harmless on single-TC chips.
    """
    Dp = _round_up(D, 128)
    row_bytes = _round_up(T, 8) * Dp * itemsize      # padded bytes of one full-T row
    tB_min = B if B <= 8 else 8

    if tB_min * row_bytes <= budget_bytes:
        # Whole time axis fits for the minimum batch tile: take tT = T.
        tT = T
        if B <= 8:
            tB = B
        else:
            fit = budget_bytes // row_bytes
            if B < 16:
                tB = B if fit >= B else max(8, (min(fit, B) // 8) * 8)
            else:
                cap = max(8, ((B // 2) // 8) * 8)    # guarantee >= 2 B blocks
                tB = max(8, (min(fit, cap) // 8) * 8)
    else:
        # T is too long to hold fully: stream over T with resident accumulators.
        tB = tB_min
        rows = budget_bytes // max(1, tB * Dp * itemsize)
        tT = max(8, (rows // 8) * 8)
        if tT >= T:
            tT = T
    return tB, tT


def _make_stats_kernel(T_total, Tf, tT, D, Df, fold, mask_tail):
    """Build the kernel body with static shape info baked in.

    T_total: original number of time steps (divisor for mean/var).
    Tf, Df:  folded time / feature extents (Tf = T_total // fold, Df = fold * D).
    """
    inv_T = 1.0 / float(T_total)
    last_local = (Tf - 1) % tT  # local row of the last folded time step in the final block

    def kernel(seq_ref, out_ref, mn_ref, mx_ref, sum_ref, ssq_ref):
        kt = pl.program_id(1)
        nt = pl.num_programs(1)

        @pl.when(kt == 0)
        def _init():
            mn_ref[...] = jnp.full(mn_ref.shape, jnp.inf, jnp.float32)
            mx_ref[...] = jnp.full(mx_ref.shape, -jnp.inf, jnp.float32)
            sum_ref[...] = jnp.zeros(sum_ref.shape, jnp.float32)
            ssq_ref[...] = jnp.zeros(ssq_ref.shape, jnp.float32)

        seq = seq_ref[...].astype(jnp.float32)  # (tB, tT, Df)

        def _accumulate(s_min, s_max, s_sum):
            mn_ref[...] = jnp.minimum(mn_ref[...], jnp.min(s_min, axis=1))
            mx_ref[...] = jnp.maximum(mx_ref[...], jnp.max(s_max, axis=1))
            sum_ref[...] = sum_ref[...] + jnp.sum(s_sum, axis=1)
            ssq_ref[...] = ssq_ref[...] + jnp.sum(s_sum * s_sum, axis=1)

        def _finalize():
            # Collapse the `fold` lane segments (raw moments / min / max combine
            # trivially across segments) once, at the very end.
            def collapse(ref, op):
                out = ref[:, 0:D]
                for j in range(1, fold):
                    out = op(out, ref[:, j * D:(j + 1) * D])
                return out

            mn = collapse(mn_ref, jnp.minimum)
            mx = collapse(mx_ref, jnp.maximum)
            total = collapse(sum_ref, jnp.add)
            totsq = collapse(ssq_ref, jnp.add)
            # seq[:, -1, :] of the original layout = last folded row, last segment.
            last = seq_ref[:, last_local, pl.ds((fold - 1) * D, D)].astype(jnp.float32)
            mean = total * inv_T
            # One-pass (population) variance, clamped at 0 to guard cancellation.
            # TODO(synk): torch.std_mean is effectively centered; for |mean| >> std
            # over very long T a mean-shifted / Welford combine would be needed for
            # bit-level parity with PyTorch.
            var = jnp.maximum(totsq * inv_T - mean * mean, 0.0)
            std = jnp.sqrt(var)
            dt = out_ref.dtype
            out_ref[:, pl.ds(0 * D, D)] = last.astype(dt)
            out_ref[:, pl.ds(1 * D, D)] = mn.astype(dt)
            out_ref[:, pl.ds(2 * D, D)] = mx.astype(dt)
            out_ref[:, pl.ds(3 * D, D)] = mean.astype(dt)
            out_ref[:, pl.ds(4 * D, D)] = std.astype(dt)

        if mask_tail:
            # Pay for masking only on the last (partial) T block.
            @pl.when(kt < nt - 1)
            def _body_full():
                _accumulate(seq, seq, seq)

            @pl.when(kt == nt - 1)
            def _body_tail():
                row = jax.lax.broadcasted_iota(jnp.int32, (1, tT, 1), 1)
                valid = (kt * tT + row) < Tf
                _accumulate(jnp.where(valid, seq, jnp.inf),
                            jnp.where(valid, seq, -jnp.inf),
                            jnp.where(valid, seq, 0.0))
                _finalize()
        else:
            _accumulate(seq, seq, seq)

            @pl.when(kt == nt - 1)
            def _fin():
                _finalize()

    return kernel


@functools.partial(jax.jit, static_argnames=("block_bytes",))
def stats_model_forward(seq, *, block_bytes=8 * 1024 * 1024):
    """seq: (B, T, D) -> (B, 5*D), matching StatsModel.forward."""
    B, T, D = seq.shape
    itemsize = jnp.dtype(seq.dtype).itemsize

    # Lane folding for small D: pack `fold` consecutive time steps into the
    # 128-lane axis so vregs are fully used and VMEM tiles are not lane-padded.
    fold = 1
    if D < 128 and 128 % D == 0:
        k = 128 // D
        if T % k == 0:
            fold = k
    seq_f = seq.reshape(B, T // fold, fold * D) if fold > 1 else seq
    Tf, Df = T // fold, fold * D

    tB, tT = _choose_tiles(B, Tf, Df, itemsize, block_bytes)
    mask_tail = (Tf % tT) != 0
    grid = (pl.cdiv(B, tB), pl.cdiv(Tf, tT))

    kernel = _make_stats_kernel(T, Tf, tT, D, Df, fold, mask_tail)

    # Padded VMEM footprint -> explicit vmem limit (cap at 48 MiB for v7x safety).
    in_block = tB * _round_up(tT, 8) * _round_up(Df, 128) * itemsize
    out_block = _round_up(tB, 8) * _round_up(5 * D, 128) * itemsize
    acc_block = _round_up(tB, 8) * _round_up(Df, 128) * 4
    needed = 2 * in_block + 2 * out_block + 4 * acc_block + (4 << 20)
    vmem_limit = int(min(48 << 20, max(16 << 20, needed)))

    cost = pl.CostEstimate(
        flops=6 * B * T * D,
        transcendentals=B * D,
        bytes_accessed=B * T * D * itemsize + B * 5 * D * itemsize,
    )

    return pl.pallas_call(
        kernel,
        out_shape=jax.ShapeDtypeStruct((B, 5 * D), seq.dtype),
        grid_spec=pltpu.PrefetchScalarGridSpec(
            num_scalar_prefetch=0,
            grid=grid,
            in_specs=[pl.BlockSpec((tB, tT, Df), lambda b, t: (b, t, 0))],
            # Output block index is constant along t -> resident accumulator
            # across the reduction axis, written once in the finalize step.
            out_specs=pl.BlockSpec((tB, 5 * D), lambda b, t: (b, 0)),
            scratch_shapes=[pltpu.VMEM((tB, Df), jnp.float32) for _ in range(4)],
        ),
        compiler_params=pltpu.CompilerParams(
            dimension_semantics=("parallel", "arbitrary"),
            vmem_limit_bytes=vmem_limit,
        ),
        cost_estimate=cost,
    )(seq_f)


def _reference(seq):
    last = seq[:, -1, :]
    mn = jnp.min(seq, axis=1)
    mx = jnp.max(seq, axis=1)
    mean = jnp.mean(seq, axis=1)
    std = jnp.sqrt(jnp.mean((seq - mean[:, None, :]) ** 2, axis=1))
    return jnp.concatenate([last, mn, mx, mean, std], axis=1)


if __name__ == "__main__":
    key = jax.random.PRNGKey(0)

    # 1) Small shape consistent with the module (StatsModel has no parameters).
    #    D=32 -> lane folding (fold=4), single block, tT = T path.
    B, T, D = 2, 8, 32
    seq = jax.random.normal(key, (B, T, D), dtype=jnp.float32)
    out = jax.block_until_ready(stats_model_forward(seq))
    ref = _reference(seq)
    assert out.shape == (B, 5 * D), out.shape
    assert jnp.allclose(out, ref, atol=1e-5, rtol=1e-5), "mismatch (folded, single block)"

    # 2) Streaming path with masked tail: tiny budget forces T tiling (Tf=10, tT=8).
    B2, T2, D2 = 4, 40, 32
    seq2 = jax.random.normal(jax.random.PRNGKey(1), (B2, T2, D2), dtype=jnp.float32)
    out2 = jax.block_until_ready(stats_model_forward(seq2, block_bytes=4096))
    ref2 = _reference(seq2)
    assert out2.shape == (B2, 5 * D2), out2.shape
    assert jnp.allclose(out2, ref2, atol=1e-5, rtol=1e-5), "mismatch (tiled T, masked tail)"

    # 3) Non-folded path (128 % D != 0): lane-padded tiles, unaligned output offsets.
    B3, T3, D3 = 2, 12, 48
    seq3 = jax.random.normal(jax.random.PRNGKey(2), (B3, T3, D3), dtype=jnp.float32)
    out3 = jax.block_until_ready(stats_model_forward(seq3))
    ref3 = _reference(seq3)
    assert out3.shape == (B3, 5 * D3), out3.shape
    assert jnp.allclose(out3, ref3, atol=1e-5, rtol=1e-5), "mismatch (non-folded D)"

    # 4) B >= 16 -> tB capped (multiple B blocks on the 'parallel' axis, partial tail B block).
    B4, T4, D4 = 20, 16, 32
    seq4 = jax.random.normal(jax.random.PRNGKey(3), (B4, T4, D4), dtype=jnp.float32)
    out4 = jax.block_until_ready(stats_model_forward(seq4))
    ref4 = _reference(seq4)
    assert out4.shape == (B4, 5 * D4), out4.shape
    assert jnp.allclose(out4, ref4, atol=1e-5, rtol=1e-5), "mismatch (multi B block)"

    print("KERNEL_OK")
</pallas_src>

<mosaic_0001>
module attributes {stable_mosaic.version = 11 : i64} {
  func.func @kernel(%arg0: i32, %arg1: i32, %arg2: memref<2x2x128xf32, #tpu.memory_space<vmem>>, %arg3: memref<2x160xf32, #tpu.memory_space<vmem>>, %arg4: memref<2x128xf32, #tpu.memory_space<vmem>>, %arg5: memref<2x128xf32, #tpu.memory_space<vmem>>, %arg6: memref<2x128xf32, #tpu.memory_space<vmem>>, %arg7: memref<2x128xf32, #tpu.memory_space<vmem>>) attributes {dimension_semantics = [#tpu.dimension_semantics<parallel>, #tpu.dimension_semantics<arbitrary>], iteration_bounds = array<i64: 1, 1>, scalar_prefetch = 0 : i64, scratch_operands = 4 : i64, tpu.core_type = #tpu.core_type<tc>, window_params = [{transform_indices = @transform_0, window_bounds = array<i64: 2, 2, 128>}, {transform_indices = @transform_1, window_bounds = array<i64: 2, 160>}]} {
    %c0_i32 = arith.constant 0 : i32
    %0 = arith.cmpi eq, %arg1, %c0_i32 : i32
    %1 = arith.extui %0 : i1 to i32
    %c0_i32_0 = arith.constant 0 : i32
    %2 = arith.cmpi ne, %1, %c0_i32_0 : i32
    scf.if %2 {
      %cst_24 = arith.constant 0x7F800000 : f32
      %24 = vector.broadcast %cst_24 : f32 to vector<2x128xf32>
      %c0_25 = arith.constant 0 : index
      %c0_26 = arith.constant 0 : index
      %25 = vector.load %arg4[%c0_25, %c0_26] : memref<2x128xf32, #tpu.memory_space<vmem>>, vector<2x128xf32>
      tpu.vector_store %arg4[%c0_25, %c0_26], %24 {strides = array<i32>} : memref<2x128xf32, #tpu.memory_space<vmem>>, vector<2x128xf32>,
      %cst_27 = arith.constant 0xFF800000 : f32
      %26 = vector.broadcast %cst_27 : f32 to vector<2x128xf32>
      %c0_28 = arith.constant 0 : index
      %c0_29 = arith.constant 0 : index
      %27 = vector.load %arg5[%c0_28, %c0_29] : memref<2x128xf32, #tpu.memory_space<vmem>>, vector<2x128xf32>
      tpu.vector_store %arg5[%c0_28, %c0_29], %26 {strides = array<i32>} : memref<2x128xf32, #tpu.memory_space<vmem>>, vector<2x128xf32>,
      %cst_30 = arith.constant 0.000000e+00 : f32
      %28 = vector.broadcast %cst_30 : f32 to vector<2x128xf32>
      %c0_31 = arith.constant 0 : index
      %c0_32 = arith.constant 0 : index
      %29 = vector.load %arg6[%c0_31, %c0_32] : memref<2x128xf32, #tpu.memory_space<vmem>>, vector<2x128xf32>
      tpu.vector_store %arg6[%c0_31, %c0_32], %28 {strides = array<i32>} : memref<2x128xf32, #tpu.memory_space<vmem>>, vector<2x128xf32>,
      %cst_33 = arith.constant 0.000000e+00 : f32
      %30 = vector.broadcast %cst_33 : f32 to vector<2x128xf32>
      %c0_34 = arith.constant 0 : index
      %c0_35 = arith.constant 0 : index
      %31 = vector.load %arg7[%c0_34, %c0_35] : memref<2x128xf32, #tpu.memory_space<vmem>>, vector<2x128xf32>
      tpu.vector_store %arg7[%c0_34, %c0_35], %30 {strides = array<i32>} : memref<2x128xf32, #tpu.memory_space<vmem>>, vector<2x128xf32>,
    } else {
    }
    %c0 = arith.constant 0 : index
    %c0_1 = arith.constant 0 : index
    %c0_2 = arith.constant 0 : index
    %3 = vector.load %arg2[%c0, %c0_1, %c0_2] : memref<2x2x128xf32, #tpu.memory_space<vmem>>, vector<2x2x128xf32>
    %c0_3 = arith.constant 0 : index
    %c0_4 = arith.constant 0 : index
    %4 = vector.load %arg4[%c0_3, %c0_4] : memref<2x128xf32, #tpu.memory_space<vmem>>, vector<2x128xf32>
    %cst = arith.constant dense<0x7F800000> : vector<2x128xf32>
    %5 = vector.multi_reduction <minimumf>, %3, %cst [1] : vector<2x2x128xf32> to vector<2x128xf32>
    %6 = arith.minimumf %4, %5 : vector<2x128xf32>
    %c0_5 = arith.constant 0 : index
    %c0_6 = arith.constant 0 : index
    %7 = vector.load %arg4[%c0_5, %c0_6] : memref<2x128xf32, #tpu.memory_space<vmem>>, vector<2x128xf32>
    tpu.vector_store %arg4[%c0_5, %c0_6], %6 {strides = array<i32>} : memref<2x128xf32, #tpu.memory_space<vmem>>, vector<2x128xf32>,
    %c0_7 = arith.constant 0 : index
    %c0_8 = arith.constant 0 : index
    %8 = vector.load %arg5[%c0_7, %c0_8] : memref<2x128xf32, #tpu.memory_space<vmem>>, vector<2x128xf32>
    %cst_9 = arith.constant dense<0xFF800000> : vector<2x128xf32>
    %9 = vector.multi_reduction <maximumf>, %3, %cst_9 [1] : vector<2x2x128xf32> to vector<2x128xf32>
    %10 = arith.maximumf %8, %9 : vector<2x128xf32>
    %c0_10 = arith.constant 0 : index
    %c0_11 = arith.constant 0 : index
    %11 = vector.load %arg5[%c0_10, %c0_11] : memref<2x128xf32, #tpu.memory_space<vmem>>, vector<2x128xf32>
    tpu.vector_store %arg5[%c0_10, %c0_11], %10 {strides = array<i32>} : memref<2x128xf32, #tpu.memory_space<vmem>>, vector<2x128xf32>,
    %c0_12 = arith.constant 0 : index
    %c0_13 = arith.constant 0 : index
    %12 = vector.load %arg6[%c0_12, %c0_13] : memref<2x128xf32, #tpu.memory_space<vmem>>, vector<2x128xf32>
    %cst_14 = arith.constant dense<0.000000e+00> : vector<2x128xf32>
    %13 = vector.multi_reduction <add>, %3, %cst_14 [1] : vector<2x2x128xf32> to vector<2x128xf32>
    %14 = arith.addf %12, %13 : vector<2x128xf32>
    %c0_15 = arith.constant 0 : index
    %c0_16 = arith.constant 0 : index
    %15 = vector.load %arg6[%c0_15, %c0_16] : memref<2x128xf32, #tpu.memory_space<vmem>>, vector<2x128xf32>
    tpu.vector_store %arg6[%c0_15, %c0_16], %14 {strides = array<i32>} : memref<2x128xf32, #tpu.memory_space<vmem>>, vector<2x128xf32>,
    %c0_17 = arith.constant 0 : index
    %c0_18 = arith.constant 0 : index
    %16 = vector.load %arg7[%c0_17, %c0_18] : memref<2x128xf32, #tpu.memory_space<vmem>>, vector<2x128xf32>
    %17 = arith.mulf %3, %3 : vector<2x2x128xf32>
    %cst_19 = arith.constant dense<0.000000e+00> : vector<2x128xf32>
    %18 = vector.multi_reduction <add>, %17, %cst_19 [1] : vector<2x2x128xf32> to vector<2x128xf32>
    %19 = arith.addf %16, %18 : vector<2x128xf32>
    %c0_20 = arith.constant 0 : index
    %c0_21 = arith.constant 0 : index
    %20 = vector.load %arg7[%c0_20, %c0_21] : memref<2x128xf32, #tpu.memory_space<vmem>>, vector<2x128xf32>
    tpu.vector_store %arg7[%c0_20, %c0_21], %19 {strides = array<i32>} : memref<2x128xf32, #tpu.memory_space<vmem>>, vector<2x128xf32>,
    %c0_i32_22 = arith.constant 0 : i32
    %21 = arith.cmpi eq, %arg1, %c0_i32_22 : i32
    %22 = arith.extui %21 : i1 to i32
    %c0_i32_23 = arith.constant 0 : i32
    %23 = arith.cmpi ne, %22, %c0_i32_23 : i32
    scf.if %23 {
      %c0_24 = arith.constant 0 : index
      %c0_25 = arith.constant 0 : index
      %24 = vector.load %arg4[%c0_24, %c0_25] : memref<2x128xf32, #tpu.memory_space<vmem>>, vector<2x32xf32>
      %c0_26 = arith.constant 0 : index
      %c32 = arith.constant 32 : index
      %25 = vector.load %arg4[%c0_26, %c32] : memref<2x128xf32, #tpu.memory_space<vmem>>, vector<2x32xf32>
      %26 = arith.minimumf %24, %25 : vector<2x32xf32>
      %c0_27 = arith.constant 0 : index
      %c64 = arith.constant 64 : index
      %27 = vector.load %arg4[%c0_27, %c64] : memref<2x128xf32, #tpu.memory_space<vmem>>, vector<2x32xf32>
      %28 = arith.minimumf %26, %27 : vector<2x32xf32>
      %c0_28 = arith.constant 0 : index
      %c96 = arith.constant 96 : index
      %29 = vector.load %arg4[%c0_28, %c96] : memref<2x128xf32, #tpu.memory_space<vmem>>, vector<2x32xf32>
      %30 = arith.minimumf %28, %29 : vector<2x32xf32>
      %c0_29 = arith.constant 0 : index
      %c0_30 = arith.constant 0 : index
      %31 = vector.load %arg5[%c0_29, %c0_30] : memref<2x128xf32, #tpu.memory_space<vmem>>, vector<2x32xf32>
      %c0_31 = arith.constant 0 : index
      %c32_32 = arith.constant 32 : index
      %32 = vector.load %arg5[%c0_31, %c32_32] : memref<2x128xf32, #tpu.memory_space<vmem>>, vector<2x32xf32>
      %33 = arith.maximumf %31, %32 : vector<2x32xf32>
      %c0_33 = arith.constant 0 : index
      %c64_34 = arith.constant 64 : index
      %34 = vector.load %arg5[%c0_33, %c64_34] : memref<2x128xf32, #tpu.memory_space<vmem>>, vector<2x32xf32>
      %35 = arith.maximumf %33, %34 : vector<2x32xf32>
      %c0_35 = arith.constant 0 : index
      %c96_36 = arith.constant 96 : index
      %36 = vector.load %arg5[%c0_35, %c96_36] : memref<2x128xf32, #tpu.memory_space<vmem>>, vector<2x32xf32>
      %37 = arith.maximumf %35, %36 : vector<2x32xf32>
      %c0_37 = arith.constant 0 : index
      %c0_38 = arith.constant 0 : index
      %38 = vector.load %arg6[%c0_37, %c0_38] : memref<2x128xf32, #tpu.memory_space<vmem>>, vector<2x32xf32>
      %c0_39 = arith.constant 0 : index
      %c32_40 = arith.constant 32 : index
      %39 = vector.load %arg6[%c0_39, %c32_40] : memref<2x128xf32, #tpu.memory_space<vmem>>, vector<2x32xf32>
      %40 = arith.addf %38, %39 : vector<2x32xf32>
      %c0_41 = arith.constant 0 : index
      %c64_42 = arith.constant 64 : index
      %41 = vector.load %arg6[%c0_41, %c64_42] : memref<2x128xf32, #tpu.memory_space<vmem>>, vector<2x32xf32>
      %42 = arith.addf %40, %41 : vector<2x32xf32>
      %c0_43 = arith.constant 0 : index
      %c96_44 = arith.constant 96 : index
      %43 = vector.load %arg6[%c0_43, %c96_44] : memref<2x128xf32, #tpu.memory_space<vmem>>, vector<2x32xf32>
      %44 = arith.addf %42, %43 : vector<2x32xf32>
      %c0_45 = arith.constant 0 : index
      %c0_46 = arith.constant 0 : index
      %45 = vector.load %arg7[%c0_45, %c0_46] : memref<2x128xf32, #tpu.memory_space<vmem>>, vector<2x32xf32>
      %c0_47 = arith.constant 0 : index
      %c32_48 = arith.constant 32 : index
      %46 = vector.load %arg7[%c0_47, %c32_48] : memref<2x128xf32, #tpu.memory_space<vmem>>, vector<2x32xf32>
      %47 = arith.addf %45, %46 : vector<2x32xf32>
      %c0_49 = arith.constant 0 : index
      %c64_50 = arith.constant 64 : index
      %48 = vector.load %arg7[%c0_49, %c64_50] : memref<2x128xf32, #tpu.memory_space<vmem>>, vector<2x32xf32>
      %49 = arith.addf %47, %48 : vector<2x32xf32>
      %c0_51 = arith.constant 0 : index
      %c96_52 = arith.constant 96 : index
      %50 = vector.load %arg7[%c0_51, %c96_52] : memref<2x128xf32, #tpu.memory_space<vmem>>, vector<2x32xf32>
      %51 = arith.addf %49, %50 : vector<2x32xf32>
      %c0_53 = arith.constant 0 : index
      %c1 = arith.constant 1 : index
      %c96_54 = arith.constant 96 : index
      %52 = vector.load %arg2[%c0_53, %c1, %c96_54] : memref<2x2x128xf32, #tpu.memory_space<vmem>>, vector<2x1x32xf32>
      %53 = vector.shape_cast %52 : vector<2x1x32xf32> to vector<2x32xf32>
      %cst_55 = arith.constant 1.250000e-01 : f32
      %54 = vector.broadcast %cst_55 : f32 to vector<2x32xf32>
      %55 = arith.mulf %44, %54 : vector<2x32xf32>
      %cst_56 = arith.constant 1.250000e-01 : f32
      %56 = vector.broadcast %cst_56 : f32 to vector<2x32xf32>
      %57 = arith.mulf %51, %56 : vector<2x32xf32>
      %58 = arith.mulf %55, %55 : vector<2x32xf32>
      %59 = arith.subf %57, %58 : vector<2x32xf32>
      %cst_57 = arith.constant 0.000000e+00 : f32
      %60 = vector.broadcast %cst_57 : f32 to vector<2x32xf32>
      %61 = arith.maximumf %59, %60 : vector<2x32xf32>
      %62 = math.sqrt %61 : vector<2x32xf32>
      %c0_58 = arith.constant 0 : index
      %c0_59 = arith.constant 0 : index
      %63 = vector.load %arg3[%c0_58, %c0_59] : memref<2x160xf32, #tpu.memory_space<vmem>>, vector<2x32xf32>
      tpu.vector_store %arg3[%c0_58, %c0_59], %53 {strides = array<i32>} : memref<2x160xf32, #tpu.memory_space<vmem>>, vector<2x32xf32>,
      %c0_60 = arith.constant 0 : index
      %c32_61 = arith.constant 32 : index
      %64 = vector.load %arg3[%c0_60, %c32_61] : memref<2x160xf32, #tpu.memory_space<vmem>>, vector<2x32xf32>
      tpu.vector_store %arg3[%c0_60, %c32_61], %30 {strides = array<i32>} : memref<2x160xf32, #tpu.memory_space<vmem>>, vector<2x32xf32>,
      %c0_62 = arith.constant 0 : index
      %c64_63 = arith.constant 64 : index
      %65 = vector.load %arg3[%c0_62, %c64_63] : memref<2x160xf32, #tpu.memory_space<vmem>>, vector<2x32xf32>
      tpu.vector_store %arg3[%c0_62, %c64_63], %37 {strides = array<i32>} : memref<2x160xf32, #tpu.memory_space<vmem>>, vector<2x32xf32>,
      %c0_64 = arith.constant 0 : index
      %c96_65 = arith.constant 96 : index
      %66 = vector.load %arg3[%c0_64, %c96_65] : memref<2x160xf32, #tpu.memory_space<vmem>>, vector<2x32xf32>
      tpu.vector_store %arg3[%c0_64, %c96_65], %55 {strides = array<i32>} : memref<2x160xf32, #tpu.memory_space<vmem>>, vector<2x32xf32>,
      %c0_66 = arith.constant 0 : index
      %c128 = arith.constant 128 : index
      %67 = vector.load %arg3[%c0_66, %c128] : memref<2x160xf32, #tpu.memory_space<vmem>>, vector<2x32xf32>
      tpu.vector_store %arg3[%c0_66, %c128], %62 {strides = array<i32>} : memref<2x160xf32, #tpu.memory_space<vmem>>, vector<2x32xf32>,
    } else {
    }
    return
  }
  func.func @transform_0(%arg0: i32, %arg1: i32) -> (i32, i32, i32) {
    %c0_i32 = arith.constant 0 : i32
    %c0_i32_0 = arith.constant 0 : i32
    return %arg0, %arg1, %c0_i32 : i32, i32, i32
  }
  func.func @transform_1(%arg0: i32, %arg1: i32) -> (i32, i32) {
    %c0_i32 = arith.constant 0 : i32
    %c0_i32_0 = arith.constant 0 : i32
    return %arg0, %c0_i32 : i32, i32
  }
}

</mosaic_0001>

<bundles_post_ra>
// kernel: stats_model_forward.1
= control target key start
LH: loop header
LB: loop body
LE: loop exit
PB: predicated region body
PF: predicated region fallthrough
CT: control target
= control target key end

     0   :  { %vm20_vm0 = vcmask 1041408   ;;  %v274_v2 = vmov -inf   ;;  %vm37_vm1 = vcmask 1041409   ;;  %v275_v9 = vmov inf   ;;  %s335_s0 = inlined_call_operand.vmem [shape: f32[2,2,128], index: 0, kind: input, shape index: {}]   ;;  %s336_s1 = inlined_call_operand.hbm [shape: f32[2,160], index: 1, kind: output, shape index: {}]  }
   0x1   :  { %v17_v0 = vld [vmem:[%s335_s0] sm:$0x3]  ;;  %v18_v1 = vld [vmem:[%s335_s0 + $0x2] sm:$0x3]  ;;  %14 = vst [vmem:[#allocation3] sm:$0x3] %v274_v2 }
   0x2   :  { %v43_v3 = vsel %vm20_vm0, %v17_v0, -inf  ;;  %v50_v4 = vsel %vm20_vm0, %v18_v1, -inf  ;;  %v85_v5 = vmul.f32 %v17_v0, %v17_v0  ;;  %v21_v8 = vsel %vm20_vm0, %v17_v0, inf  ;;  %13 = vst [vmem:[#allocation2] sm:$0x3] %v275_v9 }
   0x3   :  { %v44_v6 = vrot.slane %v43_v3, 4  ;;  %v51_v7 = vrot.slane %v50_v4, 4  ;;  %v22_v10 = vrot.slane %v21_v8, 4  ;;  %v28_v11 = vsel %vm20_vm0, %v18_v1, inf }
   0x4   :  { %v64_v12 = vsel %vm20_vm0, %v17_v0, 0.0  ;;  %v29_v15 = vrot.slane %v28_v11, 4  ;;  %v276_v16 = vmov 0.0  }
   0x5   :  { %v45_v13 = vmax.f32 %v43_v3, %v44_v6  ;;  %v52_v14 = vmax.f32 %v50_v4, %v51_v7  ;;  %15 = vst [vmem:[#allocation4] sm:$0x3] %v276_v16  ;;  %v65_v17 = vrot.slane %v64_v12, 4 }
   0x6   :  { %6 = vsyncpa [#allocation7], 0  ;;  %v23_v18 = vmin.f32 %v21_v8, %v22_v10  ;;  %v71_v19 = vsel %vm20_vm0, %v18_v1, 0.0  ;;  %16 = vst [vmem:[#allocation5] sm:$0x3] %v276_v16  ;;  %v86_v20 = vmul.f32 %v18_v1, %v18_v1  ;;  %v87_v21 = vsel %vm20_vm0, %v85_v5, 0.0 }
   0x7   :  { %v46_v22 = vrot.slane %v45_v13, 2  ;;  %v53_v23 = vrot.slane %v52_v14, 2  ;;  %v30_v24 = vmin.f32 %v28_v11, %v29_v15  ;;  %v66_v25 = vadd.f32 %v65_v17, %v64_v12  ;;  %s277_s10 = smov 96   ;;  %s278_s11 = smov 64   ;;  %v167_v15 = vld [vmem:[%s335_s0 + $0x3] sm:$0x1] }
   0x8   :  { %v24_v26 = vrot.slane %v23_v18, 2  ;;  %v72_v27 = vrot.slane %v71_v19, 4  ;;  %v88_v28 = vrot.slane %v87_v21, 4  ;;  %v94_v29 = vsel %vm20_vm0, %v86_v20, 0.0  ;;  %v42_v46 = vld [vmem:[#allocation3] sm:$0x3] }
   0x9   :  { %v47_v30 = vmax.f32 %v45_v13, %v46_v22  ;;  %v54_v31 = vmax.f32 %v52_v14, %v53_v23  ;;  %v31_v32 = vrot.slane %v30_v24, 2  ;;  %v67_v33 = vrot.slane %v66_v25, 2  ;;  %v19_v56 = vld [vmem:[#allocation2] sm:$0x3]  ;;  %s279_s12 = smov 32   ;;  %s230_s20 = sshll.u32 %s336_s1, 4  ;;  %s231_s20 = int_to_ptr.hbm [resolvable:$true] %s230_s20 }
   0xa   :  { %v25_v34 = vmin.f32 %v23_v18, %v24_v26  ;;  %v73_v35 = vadd.f32 %v72_v27, %v71_v19  ;;  %v89_v36 = vadd.f32 %v88_v28, %v87_v21  ;;  %v95_v37 = vrot.slane %v94_v29, 4  ;;  %v166_v17 = vld [vmem:[%s335_s0 + $0x1] sm:$0x1]  ;;  %s280_s0 = smov [#allocation6]  }
   0xb   :  { %v48_v38 = vrot.slane %v47_v30, 1  ;;  %v55_v39 = vrot.slane %v54_v31, 1  ;;  %v32_v40 = vmin.f32 %v30_v24, %v31_v32  ;;  %v68_v41 = vadd.f32 %v67_v33, %v66_v25  ;;  %s228_s17 = sshll.u32 %s280_s0, 4  ;;  %s229_s17 = int_to_ptr.vmem [resolvable:$true] %s228_s17 }
   0xc   :  { %v26_v42 = vrot.slane %v25_v34, 1  ;;  %v74_v43 = vrot.slane %v73_v35, 2  ;;  %v90_v44 = vrot.slane %v89_v36, 2  ;;  %v96_v45 = vadd.f32 %v95_v37, %v94_v29  ;;  %v63_v1 = vld [vmem:[#allocation4] sm:$0x3] }
   0xd   :  { %v49_v47 = vmax.f32 %v47_v30, %v48_v38  ;;  %v56_v48 = vmax.f32 %v54_v31, %v55_v39  ;;  %v33_v49 = vrot.slane %v32_v40, 1  ;;  %v69_v50 = vrot.slane %v68_v41, 1  ;;  %v84_v6 = vld [vmem:[#allocation5] sm:$0x3] }
   0xe   :  { %v27_v51 = vmin.f32 %v25_v34, %v26_v42  ;;  %v75_v52 = vadd.f32 %v74_v43, %v73_v35  ;;  %v91_v53 = vadd.f32 %v90_v44, %v89_v36  ;;  %v97_v54 = vrot.slane %v96_v45, 2 }
   0xf   :  { %v59_v55 = vsel %vm37_vm1, %v56_v48, %v49_v47  ;;  %v34_v57 = vmin.f32 %v32_v40, %v33_v49  ;;  %v70_v58 = vadd.f32 %v69_v50, %v68_v41  ;;  %v191_v16 = vrot.slane %v167_v15, 7 }
  0x10   :  { %v61_v59 = vmax.f32 %v42_v46, %v59_v55  ;;  %v76_v60 = vrot.slane %v75_v52, 1  ;;  %v92_v61 = vrot.slane %v91_v53, 1  ;;  %v98_v62 = vadd.f32 %v97_v54, %v96_v45 }
  0x11   :  { %v38_v63 = vsel %vm37_vm1, %v34_v57, %v27_v51  ;;  %v192_v18 = vsel %vm37_vm1, %v191_v16, %v166_v17  ;;  %vm193_vm2 = vcmask 1043459   ;;  %vm195_vm3 = vcmask 1045509  }
  0x12   :  { %62 = vst [vmem:[#allocation3] sm:$0x3] %v61_v59  ;;  %v40_v0 = vmin.f32 %v19_v56, %v38_v63  ;;  %v77_v2 = vadd.f32 %v76_v60, %v75_v52  ;;  %v93_v3 = vadd.f32 %v92_v61, %v91_v53  ;;  %v99_v4 = vrot.slane %v98_v62, 1 }
  0x13   :  { %vm197_vm4 = vcmask 1047559   ;;  %v194_v19 = vsel %vm193_vm2, %v191_v16, %v192_v18  ;;  %vm202_vm6 = vcmask 254976   ;;  %vm208_vm8 = vcmask 517376  }
  0x14   :  { %41 = vst [vmem:[#allocation2] sm:$0x3] %v40_v0  ;;  %v80_v5 = vsel %vm37_vm1, %v77_v2, %v70_v58  ;;  %v100_v7 = vadd.f32 %v99_v4, %v98_v62  ;;  %v196_v20 = vsel %vm195_vm3, %v191_v16, %v194_v19  ;;  %vm214_vm9 = vcmask 779776  }
  0x15   :  { %v82_v8 = vadd.f32 %v80_v5, %v63_v1  ;;  %v198_v22 = vsel %vm197_vm4, %v191_v16, %v196_v20  ;;  %vm220_vm10 = vcmask 1042176  }
  0x16   :  { %v103_v9 = vsel %vm37_vm1, %v100_v7, %v93_v3 }
  0x17   :  { %83 = vst [vmem:[#allocation4] sm:$0x3] %v82_v8  ;;  %v105_v10 = vadd.f32 %v103_v9, %v84_v6 }
  0x19   :  { %v124_v11 = vld [vmem:[#allocation3] sm:$0x3]  ;;  %106 = vst [vmem:[#allocation5] sm:$0x3] %v105_v10 }
  0x1a   :  { %126 = vrot.lane.b32.xlu1 %v124_v11, %s277_s10 }
  0x1b   :  { %v110_v12 = vld [vmem:[#allocation2] sm:$0x3] }
  0x1c   :  { %112 = vrot.lane.b32.xlu0 %v110_v12, %s277_s10 }
  0x1e   :  { %v138_v13 = vld [vmem:[#allocation4] sm:$0x3] }
  0x1f   :  { %144 = vrot.lane.b32.xlu2 %v138_v13, %s278_s11 }
  0x20   :  { %v152_v14 = vld [vmem:[#allocation5] sm:$0x3] }
  0x22   :  { %116 = vrot.lane.b32.xlu1 %v110_v12, %s278_s11 }
  0x24   :  { %140 = vrot.lane.b32.xlu0 %v138_v13, %s277_s10 }
  0x27   :  { %130 = vrot.lane.b32.xlu2 %v124_v11, %s278_s11 }
  0x2a   :  { %148 = vrot.lane.b32.xlu1 %v138_v13, %s279_s12 }
  0x2c   :  { %120 = vrot.lane.b32.xlu0 %v110_v12, %s279_s12 }
  0x2f   :  { %134 = vrot.lane.b32.xlu2 %v124_v11, %s279_s12 }
  0x32   :  { %158 = vrot.lane.b32.xlu1 %v152_v14, %s278_s11 }
  0x34   :  { %154 = vrot.lane.b32.xlu0 %v152_v14, %s277_s10 }
  0x37   :  { %162 = vrot.lane.b32.xlu2 %v152_v14, %s279_s12 }
  0x3c   :  { %199 = vrot.lane.b32.xlu0 %v198_v22, %s279_s12 }
  0x79   :  { %v145_v21 = vpop.permute.xlu2 %144 }
  0x81   :  { %v131_v23 = vpop.permute.xlu2 %130 }
  0x89   :  { %v135_v27 = vpop.permute.xlu2 %134 }
  0x8c   :  { %v127_v24 = vpop.permute.xlu1 %126 }
  0x8d   :  { %v129_v25 = vmax.f32 %v124_v11, %v127_v24 }
  0x8e   :  { %v113_v26 = vpop.permute.xlu0 %112 }
  0x8f   :  { %v133_v28 = vmax.f32 %v129_v25, %v131_v23  ;;  %v115_v33 = vmin.f32 %v110_v12, %v113_v26 }
  0x91   :  { %v137_v29 = vmax.f32 %v133_v28, %v135_v27  ;;  %v163_v44 = vpop.permute.xlu2 %162 }
  0x93   :  { %211 = vrot.lane.b32.xlu2 %v137_v29, %s278_s11 }
  0x94   :  { %v117_v30 = vpop.permute.xlu1 %116 }
  0x95   :  { %v119_v36 = vmin.f32 %v115_v33, %v117_v30 }
  0x96   :  { %v141_v31 = vpop.permute.xlu0 %140 }
  0x97   :  { %v143_v32 = vadd.f32 %v141_v31, %v138_v13 }
  0x99   :  { %v147_v34 = vadd.f32 %v145_v21, %v143_v32 }
  0x9c   :  { %v149_v35 = vpop.permute.xlu1 %148 }
  0x9d   :  { %v151_v37 = vadd.f32 %v149_v35, %v147_v34 }
  0x9e   :  { %v121_v38 = vpop.permute.xlu0 %120 }
  0x9f   :  { %v168_v39 = vmul.f32 0.125, %v151_v37  ;;  %v123_v40 = vmin.f32 %v119_v36, %v121_v38 }
  0xa1   :  { %205 = vrot.lane.b32.xlu1 %v123_v40, %s279_s12  ;;  %217 = vrot.lane.b32.xlu0 %v168_v39, %s277_s10  ;;  %v170_v47 = vmul.f32 %v168_v39, %v168_v39 }
  0xa4   :  { %v159_v42 = vpop.permute.xlu1 %158 }
  0xa6   :  { %v155_v41 = vpop.permute.xlu0 %154 }
  0xa7   :  { %v157_v43 = vadd.f32 %v155_v41, %v152_v14 }
  0xa9   :  { %v161_v45 = vadd.f32 %v159_v42, %v157_v43 }
  0xab   :  { %v165_v46 = vadd.f32 %v163_v44, %v161_v45 }
  0xad   :  { %v169_v48 = vmul.f32 0.125, %v165_v46 }
  0xae   :  { %v200_v61 = vpop.permute.xlu0 %199 }
  0xaf   :  { %v171_v49 = vsub.f32 %v169_v48, %v170_v47  ;;  %203 = vst.msk [vmem:[#allocation6] sm:$0x3] %vm202_vm6, %v200_v61 }
  0xb1   :  { %v172_v50 = vmax.f32 %v171_v49, 0.0 }
  0xb3   :  { %246 = vrsqrt.f32 %v172_v50  ;;  %vm180_vm5 = vcmp.eq.f32.partialorder %v172_v50, inf  ;;  %v183_v58 = vand.u32 2147483648, %v172_v50  ;;  %vm182_vm7 = vcmp.eq.f32.partialorder %v172_v50, 0.0 }
  0xb9   :  { %v247_v51 = vpop.eup %246 }
  0xba   :  { %v174_v52 = vmul.f32 %v247_v51, %v172_v50 }
  0xbc   :  { %v175_v53 = vmul.f32 %v247_v51, %v174_v52 }
  0xbe   :  { %v176_v54 = vmul.f32 0.5, %v175_v53 }
  0xc0   :  { %v177_v55 = vsub.f32 1.5, %v176_v54 }
  0xc2   :  { %v178_v56 = vmul.f32 %v247_v51, %v177_v55 }
  0xc4   :  { %v179_v57 = vmul.f32 %v178_v56, %v172_v50 }
  0xc6   :  { %v181_v59 = vsel %vm180_vm5, %v172_v50, %v179_v57 }
  0xc7   :  { %v184_v60 = vsel %vm182_vm7, %v183_v58, %v181_v59 }
  0xc8   :  { %222 = vst.msk [vmem:[#allocation6 + $0x2] sm:$0x3] %vm202_vm6, %v184_v60 }
  0xed   :  { %v212_v0 = vpop.permute.xlu2 %211 }
 0x113   :  { %v206_v62 = vpop.permute.xlu1 %205  ;;  %v218_v63 = vpop.permute.xlu0 %217 }
 0x114   :  { %209 = vst.msk [vmem:[#allocation6] sm:$0x3] %vm208_vm8, %v206_v62 }
 0x115   :  { %215 = vst.msk [vmem:[#allocation6] sm:$0x3] %vm214_vm9, %v212_v0 }
 0x116   :  { %221 = vst.msk [vmem:[#allocation6] sm:$0x3] %vm220_vm10, %v218_v63 }
 0x117   :  { %233 = dma.vmem_to_hbm [thread:$0]  %s229_s17, 64, %s231_s20, [#allocation7]  }
 0x118   :  { %272 = dma.done.wait [#allocation7], 64  }
 0x119   :  { %273 = vsyncadd [#allocation7], 4294967232 }
 0x11a   :  { %238 = vsyncpa [#allocation7], 1 }

</bundles_post_ra>
